<compile_context>
chip_gen: v6e
topology: v6e:2x2x1
jax: 0.10.0
libtpu: 0.0.40
codegen_flags: <defaults>
</compile_context>

<pallas_src>
import functools

import jax
import jax.numpy as jnp
from jax import lax
from jax.experimental import pallas as pl
from jax.experimental.pallas import tpu as pltpu

EPS = 1e-5
NEG_SLOPE = 0.2
SUBLANE = 8
NCORE_SPLIT = 2  # per-TensorCore partial-stats slabs (uses both TCs on v7x)


def _round_up(x, m):
    return ((x + m - 1) // m) * m


def _vmem_limit_bytes():
    """Generation-aware scoped-VMEM limit.

    v7x has 64 MiB physical VMEM (keep ~48 MiB of budget + headroom); v5e/v6e
    have 128 MiB (allow up to 96 MiB).  Falls back to a value safe everywhere.
    """
    default = 48 * 1024 * 1024
    try:
        cap = int(getattr(pltpu.get_tpu_info(), "vmem_capacity_bytes", 0))
    except Exception:
        return default
    if cap <= 0:
        return default
    return int(min(cap * 3 // 4, 96 * 1024 * 1024))


# --------------------------------------------------------------------------
# Pass A: conv-as-matmul (MXU) + per-core one-pass sufficient statistics.
# --------------------------------------------------------------------------
def _conv_stats_kernel(patches_ref, w_ref, stats_ref):
    @pl.when(pl.program_id(1) == 0)
    def _():
        stats_ref[...] = jnp.zeros_like(stats_ref)

    # (TM, KD) @ (KD, C_out) -> (TM, C_out), f32 accumulation on the MXU.
    y = jnp.dot(patches_ref[...], w_ref[...], preferred_element_type=jnp.float32)
    # One-pass sufficient statistics.  NOTE: E[y^2] - E[y]^2 can cancel for
    # very large M when |mean| >> std; the fold clamps var at 0.  Accumulation
    # is f32 throughout.
    stats_ref[0:1, :] += jnp.sum(y, axis=0, keepdims=True)        # sum(y)
    stats_ref[1:2, :] += jnp.sum(y * y, axis=0, keepdims=True)    # sum(y^2)


# --------------------------------------------------------------------------
# Pass B: re-run the cheap matmul, apply folded BN affine + LeakyReLU(0.2).
# --------------------------------------------------------------------------
def _conv_bn_lrelu_kernel(patches_ref, w_ref, sc_ref, out_ref):
    y = jnp.dot(patches_ref[...], w_ref[...], preferred_element_type=jnp.float32)
    z = y * sc_ref[0:1, :] + sc_ref[1:2, :]          # one FMA per element
    out_ref[...] = jnp.maximum(z, NEG_SLOPE * z).astype(out_ref.dtype)


# --------------------------------------------------------------------------
# Wrapper
# --------------------------------------------------------------------------
def stride_conv_forward(x, weight, gamma, beta, *, kernel_size, stride,
                        use_bf16=True, row_tile=None):
    """x: (N, C_in, L) f32; weight: (C_out, C_in, K); gamma/beta: (C_out,).

    Matches the PyTorch module in TRAIN mode (batch statistics).  The conv
    bias is intentionally not taken: train-mode BatchNorm subtracts the batch
    mean, so a per-channel bias cancels exactly.  Do NOT reuse this path with
    eval-mode running statistics without re-adding the bias.
    """
    N, C_in, L = x.shape
    C_out = weight.shape[0]
    K = kernel_size
    pad = K // 2
    assert pad < L, "ReflectionPad1d requires padding < input length"

    # ---- XLA glue: reflection pad + im2col (bf16 halves patch HBM traffic) ----
    # TODO(synk): build patch tiles in-kernel from strided windows of x_pad.
    x_pad = jnp.pad(x, ((0, 0), (0, 0), (pad, pad)), mode="reflect")
    L_pad = L + 2 * pad
    L_out = (L_pad - K) // stride + 1
    M = N * L_out
    KD = C_in * K

    idx = jnp.arange(L_out)[:, None] * stride + jnp.arange(K)[None, :]
    patches = x_pad[:, :, idx]                                # (N, C_in, L_out, K)
    patches = jnp.transpose(patches, (0, 2, 1, 3)).reshape(M, KD)

    mm_dtype = jnp.bfloat16 if use_bf16 else jnp.float32
    itemsize = jnp.dtype(mm_dtype).itemsize

    # ---- tile sizing from a generation-aware VMEM budget ----
    vmem_limit = _vmem_limit_bytes()
    if row_tile is None:
        row_tile = 2048 if C_out <= 256 else 1024
    # Double-buffered streamed operands; Mosaic lane-pads VMEM buffers to 128.
    per_row = (2 * _round_up(KD, 128) * itemsize
               + 2 * _round_up(C_out, 128) * 4)
    tm_cap = max(SUBLANE, ((vmem_limit // 2) // per_row) // SUBLANE * SUBLANE)
    TM = min(row_tile, tm_cap, _round_up(M, SUBLANE))
    M_pad = _round_up(M, NCORE_SPLIT * TM)   # zero rows contribute 0 to stats

    patches = jnp.pad(patches, ((0, M_pad - M), (0, 0))).astype(mm_dtype)
    w2d = weight.reshape(C_out, KD).T.astype(mm_dtype)        # (KD, C_out)

    n_tiles = M_pad // TM
    tiles_per_core = n_tiles // NCORE_SPLIT

    # ---- pass A: per-core partial sufficient statistics (tiny HBM output) ----
    stats_parts = pl.pallas_call(
        _conv_stats_kernel,
        grid=(NCORE_SPLIT, tiles_per_core),
        in_specs=[
            pl.BlockSpec((TM, KD), lambda c, j: (c * tiles_per_core + j, 0)),
            pl.BlockSpec((KD, C_out), lambda c, j: (0, 0)),
        ],
        out_specs=pl.BlockSpec((None, 2, C_out), lambda c, j: (c, 0, 0)),
        out_shape=jax.ShapeDtypeStruct((NCORE_SPLIT, 2, C_out), jnp.float32),
        compiler_params=pltpu.CompilerParams(
            dimension_semantics=("parallel", "arbitrary"),
            vmem_limit_bytes=vmem_limit),
    )(patches, w2d)

    # ---- fold BN once (few-element XLA): scale/shift from batch statistics ----
    stats = jnp.sum(stats_parts, axis=0)                       # (2, C_out)
    mean = stats[0] / M
    var = jnp.maximum(stats[1] / M - mean * mean, 0.0)
    scale = gamma * lax.rsqrt(var + EPS)
    shift = beta - mean * scale
    scale_shift = jnp.stack([scale, shift], axis=0).astype(jnp.float32)

    # ---- pass B: matmul + fused BN affine + LeakyReLU, true-C_out output ----
    out2d = pl.pallas_call(
        _conv_bn_lrelu_kernel,
        grid=(n_tiles,),
        in_specs=[
            pl.BlockSpec((TM, KD), lambda i: (i, 0)),
            pl.BlockSpec((KD, C_out), lambda i: (0, 0)),
            pl.BlockSpec((2, C_out), lambda i: (0, 0)),
        ],
        out_specs=pl.BlockSpec((TM, C_out), lambda i: (i, 0)),
        out_shape=jax.ShapeDtypeStruct((M_pad, C_out), jnp.float32),
        compiler_params=pltpu.CompilerParams(
            dimension_semantics=("parallel",),
            vmem_limit_bytes=vmem_limit),
    )(patches, w2d, scale_shift)

    # ---- back to PyTorch layout (N, C_out, L_out) ----
    # TODO(synk): write a C-major tile in-kernel (XLU transpose) to drop this pass.
    out = out2d[:M].reshape(N, L_out, C_out)
    return jnp.transpose(out, (0, 2, 1))


# --------------------------------------------------------------------------
# Pure-JAX reference matching the PyTorch module (train-mode BN, with bias).
# --------------------------------------------------------------------------
def _reference(x, weight, bias, gamma, beta, *, kernel_size, stride):
    pad = kernel_size // 2
    x_pad = jnp.pad(x, ((0, 0), (0, 0), (pad, pad)), mode="reflect")
    y = lax.conv_general_dilated(
        x_pad, weight, window_strides=(stride,), padding="VALID",
        dimension_numbers=("NCH", "OIH", "NCH"),
        precision=lax.Precision.HIGHEST)
    y = y + bias[None, :, None]
    mean = jnp.mean(y, axis=(0, 2), keepdims=True)
    var = jnp.mean((y - mean) ** 2, axis=(0, 2), keepdims=True)
    y_hat = (y - mean) * lax.rsqrt(var + EPS)
    z = y_hat * gamma[None, :, None] + beta[None, :, None]
    return jnp.where(z >= 0, z, NEG_SLOPE * z)


if __name__ == "__main__":
    # Small deterministic config consistent with the module.
    N, C_in, L = 2, 4, 16
    C_out, K, stride = 8, 5, 2

    key = jax.random.PRNGKey(0)
    kx, kw, kb, kg, kbe = jax.random.split(key, 5)

    x = jax.random.normal(kx, (N, C_in, L), dtype=jnp.float32)
    fan_in = C_in * K
    bound = 1.0 / jnp.sqrt(fan_in)
    weight = jax.random.uniform(kw, (C_out, C_in, K), minval=-bound,
                                maxval=bound, dtype=jnp.float32)
    bias = jax.random.uniform(kb, (C_out,), minval=-bound, maxval=bound,
                              dtype=jnp.float32)
    gamma = 1.0 + 0.1 * jax.random.normal(kg, (C_out,), dtype=jnp.float32)
    beta = 0.1 * jax.random.normal(kbe, (C_out,), dtype=jnp.float32)

    fwd_f32 = jax.jit(functools.partial(
        stride_conv_forward, kernel_size=K, stride=stride, use_bf16=False))
    fwd_bf16 = jax.jit(functools.partial(
        stride_conv_forward, kernel_size=K, stride=stride, use_bf16=True))

    ref = _reference(x, weight, bias, gamma, beta, kernel_size=K, stride=stride)

    # f32 matmul path: tight check against the f32 reference.
    out_f32 = jax.block_until_ready(fwd_f32(x, weight, gamma, beta))
    assert out_f32.shape == ref.shape, (out_f32.shape, ref.shape)
    err_f32 = float(jnp.max(jnp.abs(out_f32 - ref)))
    assert jnp.allclose(out_f32, ref, atol=5e-4, rtol=5e-4), err_f32

    # bf16 MXU path (default / perf path): bf16-level tolerance.
    out_bf16 = jax.block_until_ready(fwd_bf16(x, weight, gamma, beta))
    err_bf16 = float(jnp.max(jnp.abs(out_bf16 - ref)))
    assert jnp.allclose(out_bf16, ref, atol=3e-2, rtol=3e-2), err_bf16

    print("KERNEL_OK")
</pallas_src>

<mosaic_0001>
module attributes {stable_mosaic.version = 11 : i64} {
  func.func @_conv_stats_kernel(%arg0: i32, %arg1: i32, %arg2: memref<16x20xf32, #tpu.memory_space<vmem>>, %arg3: memref<20x8xf32, #tpu.memory_space<vmem>>, %arg4: memref<1x2x8xf32, #tpu.memory_space<vmem>>) attributes {dimension_semantics = [#tpu.dimension_semantics<parallel>, #tpu.dimension_semantics<arbitrary>], iteration_bounds = array<i64: 2, 1>, scalar_prefetch = 0 : i64, scratch_operands = 0 : i64, tpu.core_type = #tpu.core_type<tc>, window_params = [{transform_indices = @transform_0, window_bounds = array<i64: 16, 20>}, {pipeline_mode = #tpu.pipeline_mode<synchronous>, transform_indices = @transform_1, window_bounds = array<i64: 20, 8>}, {transform_indices = @transform_2, window_bounds = array<i64: 1, 2, 8>}]} {
    %c0_i32 = arith.constant 0 : i32
    %0 = arith.cmpi eq, %arg1, %c0_i32 : i32
    %1 = arith.extui %0 : i1 to i32
    %c0_i32_0 = arith.constant 0 : i32
    %2 = arith.cmpi ne, %1, %c0_i32_0 : i32
    scf.if %2 {
      %cst_17 = arith.constant 0.000000e+00 : f32
      %23 = vector.broadcast %cst_17 : f32 to vector<2x8xf32>
      %c0_18 = arith.constant 0 : index
      %c0_19 = arith.constant 0 : index
      %c0_20 = arith.constant 0 : index
      %24 = vector.load %arg4[%c0_18, %c0_19, %c0_20] : memref<1x2x8xf32, #tpu.memory_space<vmem>>, vector<1x2x8xf32>
      %25 = vector.shape_cast %24 : vector<1x2x8xf32> to vector<2x8xf32>
      %26 = vector.shape_cast %23 : vector<2x8xf32> to vector<1x2x8xf32>
      tpu.vector_store %arg4[%c0_18, %c0_19, %c0_20], %26 {strides = array<i32>} : memref<1x2x8xf32, #tpu.memory_space<vmem>>, vector<1x2x8xf32>,
    } else {
    }
    %c0 = arith.constant 0 : index
    %c0_1 = arith.constant 0 : index
    %3 = vector.load %arg2[%c0, %c0_1] : memref<16x20xf32, #tpu.memory_space<vmem>>, vector<16x20xf32>
    %c0_2 = arith.constant 0 : index
    %c0_3 = arith.constant 0 : index
    %4 = vector.load %arg3[%c0_2, %c0_3] : memref<20x8xf32, #tpu.memory_space<vmem>>, vector<20x8xf32>
    %cst = arith.constant dense<0.000000e+00> : vector<16x8xf32>
    %5 = tpu.matmul %3, %4, %cst {dimension_numbers = #tpu.dot_dimension_numbers<[1], [0], [0], [1], [0, 0, 1, 1], [], []>} : vector<16x20xf32>, vector<20x8xf32>, vector<16x8xf32> -> vector<16x8xf32>
    %c0_4 = arith.constant 0 : index
    %c0_5 = arith.constant 0 : index
    %c0_6 = arith.constant 0 : index
    %6 = vector.load %arg4[%c0_4, %c0_5, %c0_6] : memref<1x2x8xf32, #tpu.memory_space<vmem>>, vector<1x1x8xf32>
    %7 = vector.shape_cast %6 : vector<1x1x8xf32> to vector<1x8xf32>
    %cst_7 = arith.constant dense<0.000000e+00> : vector<8xf32>
    %8 = vector.multi_reduction <add>, %5, %cst_7 [0] : vector<16x8xf32> to vector<8xf32>
    %9 = vector.shape_cast %8 : vector<8xf32> to vector<1x8xf32>
    %10 = arith.addf %7, %9 : vector<1x8xf32>
    %c0_8 = arith.constant 0 : index
    %c0_9 = arith.constant 0 : index
    %c0_10 = arith.constant 0 : index
    %11 = vector.load %arg4[%c0_8, %c0_9, %c0_10] : memref<1x2x8xf32, #tpu.memory_space<vmem>>, vector<1x1x8xf32>
    %12 = vector.shape_cast %11 : vector<1x1x8xf32> to vector<1x8xf32>
    %13 = vector.shape_cast %10 : vector<1x8xf32> to vector<1x1x8xf32>
    tpu.vector_store %arg4[%c0_8, %c0_9, %c0_10], %13 {strides = array<i32>} : memref<1x2x8xf32, #tpu.memory_space<vmem>>, vector<1x1x8xf32>,
    %c0_11 = arith.constant 0 : index
    %c1 = arith.constant 1 : index
    %c0_12 = arith.constant 0 : index
    %14 = vector.load %arg4[%c0_11, %c1, %c0_12] : memref<1x2x8xf32, #tpu.memory_space<vmem>>, vector<1x1x8xf32>
    %15 = vector.shape_cast %14 : vector<1x1x8xf32> to vector<1x8xf32>
    %16 = arith.mulf %5, %5 : vector<16x8xf32>
    %cst_13 = arith.constant dense<0.000000e+00> : vector<8xf32>
    %17 = vector.multi_reduction <add>, %16, %cst_13 [0] : vector<16x8xf32> to vector<8xf32>
    %18 = vector.shape_cast %17 : vector<8xf32> to vector<1x8xf32>
    %19 = arith.addf %15, %18 : vector<1x8xf32>
    %c0_14 = arith.constant 0 : index
    %c1_15 = arith.constant 1 : index
    %c0_16 = arith.constant 0 : index
    %20 = vector.load %arg4[%c0_14, %c1_15, %c0_16] : memref<1x2x8xf32, #tpu.memory_space<vmem>>, vector<1x1x8xf32>
    %21 = vector.shape_cast %20 : vector<1x1x8xf32> to vector<1x8xf32>
    %22 = vector.shape_cast %19 : vector<1x8xf32> to vector<1x1x8xf32>
    tpu.vector_store %arg4[%c0_14, %c1_15, %c0_16], %22 {strides = array<i32>} : memref<1x2x8xf32, #tpu.memory_space<vmem>>, vector<1x1x8xf32>,
    return
  }
  func.func @transform_0(%arg0: i32, %arg1: i32) -> (i32, i32) {
    %c1_i32 = arith.constant 1 : i32
    %0 = arith.muli %arg0, %c1_i32 : i32
    %1 = arith.addi %0, %arg1 : i32
    %c0_i32 = arith.constant 0 : i32
    %c0_i32_0 = arith.constant 0 : i32
    return %1, %c0_i32 : i32, i32
  }
  func.func @transform_1(%arg0: i32, %arg1: i32) -> (i32, i32) {
    %c0_i32 = arith.constant 0 : i32
    %c0_i32_0 = arith.constant 0 : i32
    %c0_i32_1 = arith.constant 0 : i32
    return %c0_i32, %c0_i32_0 : i32, i32
  }
  func.func @transform_2(%arg0: i32, %arg1: i32) -> (i32, i32, i32) {
    %c0_i32 = arith.constant 0 : i32
    %c0_i32_0 = arith.constant 0 : i32
    %c0_i32_1 = arith.constant 0 : i32
    return %arg0, %c0_i32, %c0_i32_0 : i32, i32, i32
  }
}

module attributes {stable_mosaic.version = 11 : i64} {
  func.func @_conv_bn_lrelu_kernel(%arg0: i32, %arg1: memref<16x20xf32, #tpu.memory_space<vmem>>, %arg2: memref<20x8xf32, #tpu.memory_space<vmem>>, %arg3: memref<2x8xf32, #tpu.memory_space<vmem>>, %arg4: memref<16x8xf32, #tpu.memory_space<vmem>>) attributes {dimension_semantics = [#tpu.dimension_semantics<parallel>], iteration_bounds = array<i64: 2>, scalar_prefetch = 0 : i64, scratch_operands = 0 : i64, tpu.core_type = #tpu.core_type<tc>, window_params = [{transform_indices = @transform_0, window_bounds = array<i64: 16, 20>}, {pipeline_mode = #tpu.pipeline_mode<synchronous>, transform_indices = @transform_1, window_bounds = array<i64: 20, 8>}, {pipeline_mode = #tpu.pipeline_mode<synchronous>, transform_indices = @transform_2, window_bounds = array<i64: 2, 8>}, {transform_indices = @transform_3, window_bounds = array<i64: 16, 8>}]} {
    %c0 = arith.constant 0 : index
    %c0_0 = arith.constant 0 : index
    %0 = vector.load %arg1[%c0, %c0_0] : memref<16x20xf32, #tpu.memory_space<vmem>>, vector<16x20xf32>
    %c0_1 = arith.constant 0 : index
    %c0_2 = arith.constant 0 : index
    %1 = vector.load %arg2[%c0_1, %c0_2] : memref<20x8xf32, #tpu.memory_space<vmem>>, vector<20x8xf32>
    %cst = arith.constant dense<0.000000e+00> : vector<16x8xf32>
    %2 = tpu.matmul %0, %1, %cst {dimension_numbers = #tpu.dot_dimension_numbers<[1], [0], [0], [1], [0, 0, 1, 1], [], []>} : vector<16x20xf32>, vector<20x8xf32>, vector<16x8xf32> -> vector<16x8xf32>
    %c0_3 = arith.constant 0 : index
    %c0_4 = arith.constant 0 : index
    %3 = vector.load %arg3[%c0_3, %c0_4] : memref<2x8xf32, #tpu.memory_space<vmem>>, vector<1x8xf32>
    %4 = vector.broadcast %3 : vector<1x8xf32> to vector<16x8xf32>
    %5 = arith.mulf %2, %4 : vector<16x8xf32>
    %c1 = arith.constant 1 : index
    %c0_5 = arith.constant 0 : index
    %6 = vector.load %arg3[%c1, %c0_5] : memref<2x8xf32, #tpu.memory_space<vmem>>, vector<1x8xf32>
    %7 = vector.broadcast %6 : vector<1x8xf32> to vector<16x8xf32>
    %8 = arith.addf %5, %7 : vector<16x8xf32>
    %cst_6 = arith.constant 2.000000e-01 : f32
    %9 = vector.broadcast %cst_6 : f32 to vector<16x8xf32>
    %10 = arith.mulf %9, %8 : vector<16x8xf32>
    %11 = arith.maximumf %8, %10 : vector<16x8xf32>
    %c0_7 = arith.constant 0 : index
    %c0_8 = arith.constant 0 : index
    %12 = vector.load %arg4[%c0_7, %c0_8] : memref<16x8xf32, #tpu.memory_space<vmem>>, vector<16x8xf32>
    tpu.vector_store %arg4[%c0_7, %c0_8], %11 {strides = array<i32>} : memref<16x8xf32, #tpu.memory_space<vmem>>, vector<16x8xf32>,
    return
  }
  func.func @transform_0(%arg0: i32) -> (i32, i32) {
    %c0_i32 = arith.constant 0 : i32
    %c0_i32_0 = arith.constant 0 : i32
    return %arg0, %c0_i32 : i32, i32
  }
  func.func @transform_1(%arg0: i32) -> (i32, i32) {
    %c0_i32 = arith.constant 0 : i32
    %c0_i32_0 = arith.constant 0 : i32
    %c0_i32_1 = arith.constant 0 : i32
    return %c0_i32, %c0_i32_0 : i32, i32
  }
  func.func @transform_2(%arg0: i32) -> (i32, i32) {
    %c0_i32 = arith.constant 0 : i32
    %c0_i32_0 = arith.constant 0 : i32
    %c0_i32_1 = arith.constant 0 : i32
    return %c0_i32, %c0_i32_0 : i32, i32
  }
  func.func @transform_3(%arg0: i32) -> (i32, i32) {
    %c0_i32 = arith.constant 0 : i32
    %c0_i32_0 = arith.constant 0 : i32
    return %arg0, %c0_i32 : i32, i32
  }
}

</mosaic_0001>

<bundles_post_ra>
// kernel: stride_conv_forward.3
= control target key start
LH: loop header
LB: loop body
LE: loop exit
PB: predicated region body
PF: predicated region fallthrough
CT: control target
= control target key end

     0   :  { %s408_s12 = smov 0   ;;  %s440_s0 = inlined_call_operand.vmem [shape: f32[32,20], index: 0, kind: input, shape index: {}]   ;;  %s441_s1 = inlined_call_operand.vmem [shape: f32[20,8], index: 1, kind: input, shape index: {}]   ;;  %s442_s2 = inlined_call_operand.vmem [shape: f32[2,8], index: 2, kind: input, shape index: {}]   ;;  %s443_s3 = inlined_call_operand.vmem [shape: f32[32,8], index: 3, kind: output, shape index: {}]  }
   0x1 LB: > { %s342_s13 = sadd.s32 4294967295, %s386_s12   ;;  %p346_p0 = scmp.ge.s32.totalorder %s386_s12, 1  ;;  %s386_s12 = sphi %s408_s12, %s13_s12  }
   0x2   : > { %p138_p1 = scmp.lt.s32.totalorder %s386_s12, 3 }
   0x4   : > { %p139_p2 = pnand %p346_p0, %p138_p1 }
   0x5   : > { %s347_s18 = sshll.u32 (!%p139_p2), %s342_s13, 1 }
   0x6   : > { %142 = sbr.rel (%p139_p2) target bundleno = 222 (0xde), region = 32  ;;  %p163_p3 = scmp.lt.s32.totalorder (!%p139_p2), %s347_s18, 3 }
   0xb   : > { %v178_v0 = vld [vmem:[%s441_s1 + $0x10] sm:$0xf]  ;;  %vm186_vm0 = vcmask 1043456   ;;  %v177_v1 = vld [vmem:[%s441_s1 + $0x8] sm:$0xff]  ;;  %v176_v2 = vld [vmem:[%s441_s1] sm:$0xff]  ;;  %s445_s18 = smov (!%p163_p3, %s347_s18), 3 }
   0xc   : > { %363 = vmatprep.subr.msk.mxu0 %vm186_vm0, %v178_v0  ;;  %s348_s21 = sshll.u32 %s445_s18, 3  ;;  %vm179_vm1 = vcmask 162816   ;;  %v354_v5 = vld [vmem:[%s442_s2] ss:$0 sm:$0xff]  ;;  %v355_v7 = vld [vmem:[%s442_s2 + $0x1] ss:$0 sm:$0xff] }
   0xd   : > { %364 = vmatpush3.msk.msra.mxu0 %vm186_vm0, %v178_v0  ;;  %s166_s24 = scalar_lea.vmem %s440_s0, %s348_s21  ;;  %s172_s4 = scalar_lea.vmem %s443_s3, %s348_s21  ;;  %vm283_vm2 = vcmask 64512  }
   0xe   : > { %365 = vmatprep.subr.mxu0 %v177_v1  ;;  %v174_v3 = vld [vmem:[%s166_s24] sm:$0xff]  ;;  %v175_v4 = vld [vmem:[%s166_s24 + $0x8] sm:$0xff] }
   0xf   : > { %366 = vmatpush3.msra.mxu0 %v177_v1  ;;  %369 = vmatprep.mubr.msk.f32.mxu0 %vm179_vm1, %v174_v3 }
  0x10   : > { %367 = vmatprep.subr.mxu0 %v176_v2 }
  0x11   : > { %368 = vmatpush3.msra.mxu0 %v176_v2 }
  0x12   : > { %370 = vmatmul.mubr.msk.f32.vlgmr.msra.gmra.mxu0 %vm179_vm1, %v175_v4 }
  0xd2   : > { %v371_v6 = vpop.f32.mrf.mxu0 }
  0xd3   : > { %v271_v8 = vmul.f32 %v371_v6, %v354_v5 }
  0xd4   : > { %v256_v9 = vpop.f32.mrf.mxu0 }
  0xd5   : > { %v278_v10 = vadd.f32 %v355_v7, %v271_v8  ;;  %v270_v11 = vmul.f32 %v354_v5, %v256_v9 }
  0xd7   : > { %v277_v12 = vadd.f32 %v355_v7, %v270_v11  ;;  %v280_v13 = vmul.f32 0.2, %v278_v10 }
  0xd9   : > { %v279_v14 = vmul.f32 0.2, %v277_v12  ;;  %v282_v16 = vmax.f32 %v278_v10, %v280_v13 }
  0xdb   : > { %v281_v15 = vmax.f32 %v277_v12, %v279_v14  ;;  %285 = vst.msk [vmem:[%s172_s4 + $0x8] sm:$0xff] %vm283_vm2, %v282_v16 }
  0xdd   : > { %284 = vst.msk [vmem:[%s172_s4] sm:$0xff] %vm283_vm2, %v281_v15 }
  0xde PF: > { %s13_s12 = sadd.s32 1, %s386_s12  }
  0xdf   : > { %p10_p4 = scmp.ge.s32.totalorder %s13_s12, 4  }
  0xe1   :  { %12 = sbr.rel (!%p10_p4) target bundleno = 1 (0x1), region = 62 }

// kernel: stride_conv_forward.2
= control target key start
LH: loop header
LB: loop body
LE: loop exit
PB: predicated region body
PF: predicated region fallthrough
CT: control target
= control target key end

     0   :  { %s441_s9 = smov 0   ;;  %s443_s10 = smov 0   ;;  %s495_s0 = inlined_call_operand.vmem [shape: f32[32,20], index: 0, kind: input, shape index: {}]   ;;  %s496_s1 = inlined_call_operand.vmem [shape: f32[20,8], index: 1, kind: input, shape index: {}]   ;;  %s497_s2 = inlined_call_operand.vmem [shape: f32[2,2,8], index: 2, kind: output, shape index: {}]  }
   0x1   :  { %s445_s11 = smov 0  }
   0x2 LB: > { %s24_s12 = sadd.s32 1, %s419_s10  ;;  %p353_p0 = scmp.ge.s32.totalorder %s423_s11, 1  ;;  %s423_s11 = sphi %s445_s11, %s12_s11   ;;  %s419_s10 = sphi %s443_s10, %s499_s10   ;;  %s415_s9 = sphi %s441_s9, %s498_s9  }
   0x3   : > { %p26_p1 = scmp.ge.s32.totalorder %s24_s12, 2  ;;  %p129_p2 = scmp.lt.s32.totalorder %s423_s11, 3 }
   0x5   : > { %s501_s12 = smov (%p26_p1, %s24_s12), 0  ;;  %p130_p3 = pnand %p353_p0, %p129_p2 }
   0x6   : > { %s354_s17 = sshll.u32 (!%p130_p3), %s415_s9, 1  ;;  %p159_p5 = scmp.lt.s32.totalorder (!%p130_p3), %s415_s9, 1 }
   0x7   : > { %133 = sbr.rel (%p130_p3) target bundleno = 234 (0xea), region = 28  ;;  %p153_p4 = scmp.lt.s32.totalorder (!%p130_p3), %s354_s17, 3 }
   0xc   : > { %v173_v0 = vld [vmem:[%s496_s1 + $0x10] sm:$0xf]  ;;  %vm181_vm0 = vcmask 1043456   ;;  %v172_v1 = vld [vmem:[%s496_s1 + $0x8] sm:$0xff]  ;;  %v171_v2 = vld [vmem:[%s496_s1] sm:$0xff]  ;;  %s503_s17 = smov (!%p153_p4, %s354_s17), 3 }
   0xd   : > { %367 = vmatprep.subr.msk.mxu0 %vm181_vm0, %v173_v0  ;;  %s355_s20 = sshll.u32 %s503_s17, 3  ;;  %vm174_vm1 = vcmask 162816   ;;  %s505_s9 = smov (!%p159_p5, %s415_s9), 1  ;;  %vm167_vm2 = vcmask 58368   ;;  %v425_v5 = vmov 0.0   ;;  %vm261_vm3 = vcmask 64512  }
   0xe   : > { %368 = vmatpush3.msk.msra.mxu0 %vm181_vm0, %v173_v0  ;;  %s156_s23 = scalar_lea.vmem %s495_s0, %s355_s20  ;;  %s356_s24 = sshll.u32 %s505_s9, 1  ;;  %vm272_vm4 = vcmask 57344  }
   0xf   : > { %369 = vmatprep.subr.mxu0 %v172_v1  ;;  %v169_v3 = vld [vmem:[%s156_s23] sm:$0xff]  ;;  %v170_v4 = vld [vmem:[%s156_s23 + $0x8] sm:$0xff]  ;;  %s479_s27 = scalar_lea.vmem %s497_s2, %s356_s24 }
  0x10   : > { %370 = vmatpush3.msra.mxu0 %v172_v1  ;;  %373 = vmatprep.mubr.msk.f32.mxu0 %vm174_vm1, %v169_v3  ;;  %168 = vst.msk [vmem:[%s479_s27] sm:$0x3] %vm167_vm2, %v425_v5 }
  0x11   : > { %371 = vmatprep.subr.mxu0 %v171_v2 }
  0x12   : > { %372 = vmatpush3.msra.mxu0 %v171_v2 }
  0x13   : > { %374 = vmatmul.mubr.msk.f32.vlgmr.msra.gmra.mxu0 %vm174_vm1, %v170_v4 }
  0x17   : > { %v260_v25 = vld [vmem:[%s479_s27] sm:$0x1]  ;;  %v274_v28 = vld [vmem:[%s479_s27 + $0x1] sm:$0x1] }
  0xd3   : > { %v375_v6 = vpop.f32.mrf.mxu0 }
  0xd4   : > { %v276_v7 = vmul.f32 %v375_v6, %v375_v6  ;;  %v263_v9 = vsel %vm261_vm3, %v375_v6, 0.0 }
  0xd5   : > { %v251_v8 = vpop.f32.mrf.mxu0 }
  0xd6   : > { %v262_v10 = vsel %vm261_vm3, %v251_v8, 0.0  ;;  %v275_v11 = vmul.f32 %v251_v8, %v251_v8  ;;  %v278_v13 = vsel %vm261_vm3, %v276_v7, 0.0 }
  0xd7   : > { %v264_v12 = vadd.f32 %v263_v9, %v262_v10 }
  0xd8   : > { %v277_v14 = vsel %vm261_vm3, %v275_v11, 0.0 }
  0xd9   : > { %v265_v15 = vrot.slane %v264_v12, 4  ;;  %v279_v16 = vadd.f32 %v278_v13, %v277_v14 }
  0xdb   : > { %v266_v17 = vadd.f32 %v265_v15, %v264_v12  ;;  %v280_v18 = vrot.slane %v279_v16, 4 }
  0xdd   : > { %v267_v19 = vrot.slane %v266_v17, 2  ;;  %v281_v20 = vadd.f32 %v280_v18, %v279_v16 }
  0xdf   : > { %v268_v21 = vadd.f32 %v267_v19, %v266_v17  ;;  %v282_v22 = vrot.slane %v281_v20, 2 }
  0xe1   : > { %v269_v23 = vrot.slane %v268_v21, 1  ;;  %v283_v24 = vadd.f32 %v282_v22, %v281_v20 }
  0xe3   : > { %v270_v26 = vadd.f32 %v269_v23, %v268_v21  ;;  %v284_v27 = vrot.slane %v283_v24, 1 }
  0xe5   : > { %v271_v29 = vadd.f32 %v270_v26, %v260_v25  ;;  %v285_v30 = vadd.f32 %v284_v27, %v283_v24 }
  0xe7   : > { %273 = vst.msk [vmem:[%s479_s27] sm:$0x1] %vm272_vm4, %v271_v29  ;;  %v286_v31 = vadd.f32 %v285_v30, %v274_v28 }
  0xe9   : > { %287 = vst.msk [vmem:[%s479_s27 + $0x1] sm:$0x1] %vm272_vm4, %v286_v31 }
  0xea PF: > { %s12_s11 = sadd.s32 1, %s423_s11   ;;  %s498_s9 = smov %s419_s10 }
  0xeb   : > { %p9_p6 = scmp.ge.s32.totalorder %s12_s11, 4   ;;  %s499_s10 = smov %s501_s12 }
  0xed   :  { %11 = sbr.rel (!%p9_p6) target bundleno = 2 (0x2), region = 62 }

</bundles_post_ra>
